<compile_context>
chip_gen: v5e
topology: v5e:2x2
jax: 0.10.0
libtpu: 0.0.40
codegen_flags: <defaults>
</compile_context>

<pallas_src>
import jax
import jax.numpy as jnp
from jax.experimental import pallas as pl
from jax.experimental.pallas import tpu as pltpu


# ----------------------------- Pallas kernel ------------------------------- #

def dlinear_kernel(w_ref, b_ref, x_ref, o_ref):
    # w_ref: (P, L)  effective weight (bf16 or f32)
    # b_ref: (P, 1)  effective bias (f32)
    # x_ref: (L, bn) lane-dense time-major input slab
    # o_ref: (P, bn) f32 output tile
    acc = jnp.dot(w_ref[...], x_ref[...], preferred_element_type=jnp.float32)
    o_ref[...] = (acc + b_ref[...]).astype(o_ref.dtype)   # bias add rides the VPU


# ------------------------------ JAX wrapper -------------------------------- #

def _build_moving_avg_matrix(seq_len, kernel_size):
    """A[t, l] such that (A @ x_time) == replicate-padded AvgPool1d(kernel, stride=1).

    Built directly from band indices (no (L, k, L) one-hot blow-up)."""
    pad = (kernel_size - 1) // 2
    src = jnp.clip(
        jnp.arange(seq_len)[:, None] + jnp.arange(kernel_size)[None, :] - pad,
        0, seq_len - 1,
    )                                                     # (L, k) source time indices
    rows = jnp.arange(seq_len)[:, None]                   # (L, 1) broadcasts to (L, k)
    a = jnp.zeros((seq_len, seq_len), jnp.float32)
    # Duplicate (clipped) indices accumulate -> exactly the replicate-padding weights.
    return a.at[rows, src].add(1.0 / kernel_size)         # (L, L)


def dlinear_forward(x_enc, ws, bs, wt, bt, *, pred_len, moving_avg,
                    block_n=2048, compute_dtype=jnp.bfloat16):
    """Fused DLinear forward. x_enc: (B, L, C) -> (B, pred_len, C)."""
    B, L, C = x_enc.shape
    P = pred_len
    # PyTorch AvgPool1d(stride=1) with (k-1)//2 replicate padding only preserves
    # the sequence length for odd kernel sizes (DLinear default moving_avg=25).
    assert moving_avg % 2 == 1, "moving_avg must be odd to match the PyTorch module"

    # --- algebraic fold (kept in f32): series_decomp + both heads -> one affine map
    A = _build_moving_avg_matrix(L, moving_avg)                 # (L, L)
    w_eff = (ws + (wt - ws) @ A).astype(compute_dtype)          # (P, L)
    b_eff = (bs + bt).reshape(P, 1).astype(jnp.float32)         # (P, 1), exact bias

    # --- collapse (batch, channel) onto the lane axis ---------------------------
    # Single fused cast+relayout XLA pass (halves the bytes the kernel streams when
    # compute_dtype is bf16).  No ones-row concat, no pad pass, no output slice.
    # TODO(synk): for channel counts >= ~128 an in-kernel relayout of a (block_b, L, C)
    #             tile would remove this wrapper pass entirely.
    N = B * C
    x2d = x_enc.astype(compute_dtype).transpose(1, 0, 2).reshape(L, N)   # (L, B*C)

    # --- lane-tile selection -----------------------------------------------------
    n_tiles128 = pl.cdiv(N, 128)
    want128 = max(1, block_n // 128)
    if n_tiles128 >= 2:
        # keep at least 2 grid steps so ("parallel",) can shard across v7x's 2 TCs
        want128 = min(want128, (n_tiles128 + 1) // 2)
    else:
        want128 = 1

    dt_bytes = jnp.dtype(compute_dtype).itemsize

    def _vmem_need(t128):
        bn_ = t128 * 128
        return (3 * L * bn_ * dt_bytes       # x slab, up to 3-deep pipeline
                + 2 * P * bn_ * 4            # f32 output tile, double-buffered
                + P * L * dt_bytes + P * 4)  # resident weight + bias

    VMEM_BUDGET = 48 * 1024 * 1024           # headroom under v7x's 64 MiB physical VMEM
    while want128 > 1 and _vmem_need(want128) > VMEM_BUDGET:
        want128 //= 2

    bn = want128 * 128
    grid = (pl.cdiv(N, bn),)
    vmem_limit = int(min(max(1.5 * _vmem_need(want128) + (2 << 20), 32 << 20), 64 << 20))

    x_spec_kwargs = {}
    if grid[0] >= 3:                         # deeper pipeline only when it can help
        x_spec_kwargs["pipeline_mode"] = pl.Buffered(3)

    y = pl.pallas_call(
        dlinear_kernel,
        out_shape=jax.ShapeDtypeStruct((P, N), jnp.float32),
        grid=grid,
        in_specs=[
            pl.BlockSpec((P, L), lambda n: (0, 0)),                 # weight (resident)
            pl.BlockSpec((P, 1), lambda n: (0, 0)),                 # bias   (resident)
            pl.BlockSpec((L, bn), lambda n: (0, n), **x_spec_kwargs),  # x slab (streamed)
        ],
        out_specs=pl.BlockSpec((P, bn), lambda n: (0, n)),          # lane-dense stores
        compiler_params=pltpu.CompilerParams(
            dimension_semantics=("parallel",),
            vmem_limit_bytes=vmem_limit,
        ),
    )(w_eff, b_eff, x2d)

    # (P, B*C) -> (B, P, C).  This final relayout is skippable if the consumer can
    # take a (P, B, C) / time-major output.
    return y.reshape(P, B, C).transpose(1, 0, 2)


# ------------------------------ JAX reference ------------------------------ #

def dlinear_reference(x_enc, ws, bs, wt, bt, *, pred_len, moving_avg):
    """Pure-JAX reference mirroring the PyTorch module (individual=False)."""
    pad = (moving_avg - 1) // 2
    front = jnp.repeat(x_enc[:, 0:1, :], pad, axis=1)
    end = jnp.repeat(x_enc[:, -1:, :], pad, axis=1)
    x_pad = jnp.concatenate([front, x_enc, end], axis=1)
    L = x_enc.shape[1]
    trend = jnp.stack(
        [x_pad[:, i:i + L, :] for i in range(moving_avg)], axis=0
    ).mean(axis=0)
    seasonal = x_enc - trend
    s_out = jnp.einsum('blc,pl->bpc', seasonal, ws) + bs[None, :, 0][:, :, None]
    t_out = jnp.einsum('blc,pl->bpc', trend, wt) + bt[None, :, 0][:, :, None]
    dec_out = s_out + t_out
    return dec_out[:, -pred_len:, :]


# ----------------------------------- main ----------------------------------- #

if __name__ == "__main__":
    # x_mark_enc / x_dec / x_mark_dec are unused by the module's forward (DLinear
    # only consumes x_enc), so they are not constructed here.
    # TODO(synk): individual=True (per-channel Linear heads) variant not implemented;
    #             the module's default (individual=False) path is what this covers.

    def _run_case(B, L, P, C, moving_avg, *, compute_dtype, block_n, atol, seed=0):
        key = jax.random.PRNGKey(seed)
        kx, kws, kwt, kbs, kbt = jax.random.split(key, 5)
        x_enc = jax.random.normal(kx, (B, L, C), dtype=jnp.float32)
        bound = 1.0 / (L ** 0.5)
        # Module init is 1/seq_len * ones for both weights; perturb so the seasonal
        # and trend heads differ (exercises the folded averaging matrix).
        ws = (jnp.full((P, L), 1.0 / L, jnp.float32)
              + 0.05 * jax.random.normal(kws, (P, L), jnp.float32))
        wt = (jnp.full((P, L), 1.0 / L, jnp.float32)
              + 0.05 * jax.random.normal(kwt, (P, L), jnp.float32))
        bs = jax.random.uniform(kbs, (P, 1), jnp.float32, -bound, bound)
        bt = jax.random.uniform(kbt, (P, 1), jnp.float32, -bound, bound)

        out = dlinear_forward(x_enc, ws, bs, wt, bt, pred_len=P,
                              moving_avg=moving_avg, block_n=block_n,
                              compute_dtype=compute_dtype)
        out = jax.block_until_ready(out)
        ref = dlinear_reference(x_enc, ws, bs, wt, bt, pred_len=P,
                                moving_avg=moving_avg)
        assert out.shape == (B, P, C), out.shape
        err = float(jnp.max(jnp.abs(out - ref)))
        assert err < atol, (str(compute_dtype), err)
        return err

    # 1) Exact-semantics check (f32 compute path) at the module's small config.
    _run_case(2, 16, 8, 4, 5, compute_dtype=jnp.float32, block_n=2048, atol=1e-4)
    # 2) Fast default path: bf16-streamed x / weight, f32 MXU accumulation.
    _run_case(2, 16, 8, 4, 5, compute_dtype=jnp.bfloat16, block_n=2048, atol=3e-2)
    # 3) Multi-step grid, ragged last lane tile (N=400), Buffered(3) pipeline path.
    _run_case(16, 24, 12, 25, 7, compute_dtype=jnp.bfloat16, block_n=128, atol=3e-2)

    print("KERNEL_OK")
</pallas_src>

<mosaic_0001>
module attributes {stable_mosaic.version = 11 : i64} {
  func.func @dlinear_kernel(%arg0: i32, %arg1: memref<8x16xf32, #tpu.memory_space<vmem>>, %arg2: memref<8x1xf32, #tpu.memory_space<vmem>>, %arg3: memref<16x128xf32, #tpu.memory_space<vmem>>, %arg4: memref<8x128xf32, #tpu.memory_space<vmem>>) attributes {dimension_semantics = [#tpu.dimension_semantics<parallel>], iteration_bounds = array<i64: 1>, scalar_prefetch = 0 : i64, scratch_operands = 0 : i64, tpu.core_type = #tpu.core_type<tc>, window_params = [{pipeline_mode = #tpu.pipeline_mode<synchronous>, transform_indices = @transform_0, window_bounds = array<i64: 8, 16>}, {pipeline_mode = #tpu.pipeline_mode<synchronous>, transform_indices = @transform_1, window_bounds = array<i64: 8, 1>}, {transform_indices = @transform_2, window_bounds = array<i64: 16, 128>}, {transform_indices = @transform_3, window_bounds = array<i64: 8, 128>}]} {
    %c0 = arith.constant 0 : index
    %c0_0 = arith.constant 0 : index
    %0 = vector.load %arg1[%c0, %c0_0] : memref<8x16xf32, #tpu.memory_space<vmem>>, vector<8x16xf32>
    %c0_1 = arith.constant 0 : index
    %c0_2 = arith.constant 0 : index
    %1 = vector.load %arg3[%c0_1, %c0_2] : memref<16x128xf32, #tpu.memory_space<vmem>>, vector<16x128xf32>
    %cst = arith.constant dense<0.000000e+00> : vector<8x128xf32>
    %2 = tpu.matmul %0, %1, %cst {dimension_numbers = #tpu.dot_dimension_numbers<[1], [0], [0], [1], [0, 0, 1, 1], [], []>} : vector<8x16xf32>, vector<16x128xf32>, vector<8x128xf32> -> vector<8x128xf32>
    %c0_3 = arith.constant 0 : index
    %c0_4 = arith.constant 0 : index
    %3 = vector.load %arg2[%c0_3, %c0_4] : memref<8x1xf32, #tpu.memory_space<vmem>>, vector<8x1xf32>
    %4 = vector.broadcast %3 : vector<8x1xf32> to vector<8x128xf32>
    %5 = arith.addf %2, %4 : vector<8x128xf32>
    %c0_5 = arith.constant 0 : index
    %c0_6 = arith.constant 0 : index
    %6 = vector.load %arg4[%c0_5, %c0_6] : memref<8x128xf32, #tpu.memory_space<vmem>>, vector<8x128xf32>
    tpu.vector_store %arg4[%c0_5, %c0_6], %5 {strides = array<i32>} : memref<8x128xf32, #tpu.memory_space<vmem>>, vector<8x128xf32>,
    return
  }
  func.func @transform_0(%arg0: i32) -> (i32, i32) {
    %c0_i32 = arith.constant 0 : i32
    %c0_i32_0 = arith.constant 0 : i32
    %c0_i32_1 = arith.constant 0 : i32
    return %c0_i32, %c0_i32_0 : i32, i32
  }
  func.func @transform_1(%arg0: i32) -> (i32, i32) {
    %c0_i32 = arith.constant 0 : i32
    %c0_i32_0 = arith.constant 0 : i32
    %c0_i32_1 = arith.constant 0 : i32
    return %c0_i32, %c0_i32_0 : i32, i32
  }
  func.func @transform_2(%arg0: i32) -> (i32, i32) {
    %c0_i32 = arith.constant 0 : i32
    %c0_i32_0 = arith.constant 0 : i32
    return %c0_i32, %arg0 : i32, i32
  }
  func.func @transform_3(%arg0: i32) -> (i32, i32) {
    %c0_i32 = arith.constant 0 : i32
    %c0_i32_0 = arith.constant 0 : i32
    return %c0_i32, %arg0 : i32, i32
  }
}

</mosaic_0001>

<bundles_post_ra>
// kernel: tpu_custom_call.1
= control target key start
LH: loop header
LB: loop body
LE: loop exit
PB: predicated region body
PF: predicated region fallthrough
CT: control target
= control target key end

     0   :  { %vm24_vm0 = vcmask 130048   ;;  %v95_v3 = vmov 0   ;;  %s132_s0 = inlined_call_operand.vmem [shape: f32[8,16], index: 0, kind: input, shape index: {}]   ;;  %s133_s1 = inlined_call_operand.vmem [shape: f32[8,1], index: 1, kind: input, shape index: {}]   ;;  %s134_s2 = inlined_call_operand.vmem [shape: f32[16,8], index: 2, kind: input, shape index: {}]   ;;  %s135_s3 = inlined_call_operand.hbm [shape: f32[8,8], index: 3, kind: output, shape index: {}]  }
   0x1   :  { %v17_v0 = vld [vmem:[%s134_s2 + $0x8] sm:$0xff]  ;;  %v16_v1 = vld [vmem:[%s134_s2] sm:$0xff]  ;;  %68 = vset.pattern.permute.xlu0 %v95_v3 }
   0x2   :  { %42 = vmatpush.msra.mxu0 %v17_v0  ;;  %v15_v2 = vld [vmem:[%s132_s0] sm:$0xff] }
   0x3   :  { %v18_v4 = vld [vmem:[%s133_s1] sm:$0xff] }
   0x4   :  { %8 = vsyncpa [#allocation3], 0  ;;  %21 = vperm.xlu0 %68, %v18_v4   ;;  %43 = vmatpush.msra.mxu0 %v16_v1  ;;  %s96_s20 = smov [#allocation2]   ;;  %s56_s23 = sshll.u32 %s135_s3, 4  ;;  %s57_s23 = int_to_ptr.hbm [resolvable:$true] %s56_s23 }
   0x5   :  { %65 = vmatmul.msk.f32.vlgmr.msra.gmra.mxu0 %vm24_vm0, %v15_v2  ;;  %s54_s21 = sshll.u32 %s96_s20, 4  ;;  %s55_s21 = int_to_ptr.vmem [resolvable:$true] %s54_s21 }
  0x76   :  { %v22_v5 = vpop.permute.xlu0 %21 }
  0x82   :  { %v45_v6 = vpop.f32.mrf.mxu0 }
  0x83   :  { %v46_v7 = vadd.f32 %v45_v6, %v22_v5 }
  0x85   :  { %48 = vst [vmem:[#allocation2] sm:$0xff] %v46_v7 }
  0x86   :  { %59 = dma.vmem_to_hbm [thread:$0]  %s55_s21, 128, %s57_s23, [#allocation3]  }
  0x87   :  { %93 = dma.done.wait [#allocation3], 128  }
  0x88   :  { %94 = vsyncadd [#allocation3], 4294967168 }
  0x89   :  { %64 = vsyncpa [#allocation3], 1 }

</bundles_post_ra>
